<compile_context>
chip_gen: v7x
topology: tpu7x:2x2x1
jax: 0.10.0
libtpu: 0.0.40
codegen_flags: <defaults>
</compile_context>

<pallas_src>
import functools

import jax
import jax.numpy as jnp
from jax.experimental import pallas as pl
from jax.experimental.pallas import tpu as pltpu


# ----------------------------------------------------------------------------
# Kernels
# ----------------------------------------------------------------------------
def _vit_output_kernel_fused(h_ref, w_ref, b_ref, r_ref, o_ref, *, compute_dtype):
    """Whole reduction resident (nk == 1): fused matmul + bias + residual."""
    h = h_ref[...]
    if compute_dtype is not None:
        h = h.astype(compute_dtype)            # in-kernel cast: no extra HBM pass
    acc = jnp.dot(h, w_ref[...], preferred_element_type=jnp.float32)
    out = acc + b_ref[...].astype(jnp.float32) + r_ref[...].astype(jnp.float32)
    o_ref[...] = out.astype(o_ref.dtype)


def _vit_output_kernel_ktiled(h_ref, w_ref, b_ref, r_ref, o_ref, acc_ref, *,
                              compute_dtype):
    """K-tiled fallback: f32 accumulator carried across the reduction axis."""
    k = pl.program_id(1)

    @pl.when(k == 0)
    def _():
        # Fold the bias into the accumulator init (saves an add in finalize).
        acc_ref[...] = jnp.broadcast_to(
            b_ref[...].astype(jnp.float32), acc_ref.shape)

    h = h_ref[...]
    if compute_dtype is not None:
        h = h.astype(compute_dtype)
    acc_ref[...] += jnp.dot(h, w_ref[...], preferred_element_type=jnp.float32)

    @pl.when(k == pl.num_programs(1) - 1)
    def _():
        o_ref[...] = (acc_ref[...]
                      + r_ref[...].astype(jnp.float32)).astype(o_ref.dtype)


# ----------------------------------------------------------------------------
# Wrapper
# ----------------------------------------------------------------------------
def _round_up(x, m):
    return (x + m - 1) // m * m


def _tpu_generation_defaults():
    """Generation-aware tile / VMEM policy (v5e vs v6e vs v7x)."""
    kind = ""
    try:
        kind = jax.devices()[0].device_kind.lower()
    except Exception:
        pass
    vmem_phys = None
    try:
        vmem_phys = pltpu.get_tpu_info().vmem_capacity_bytes
    except Exception:
        pass

    is_v7 = ("v7" in kind) or (vmem_phys is not None and vmem_phys <= (64 << 20))
    is_v5e = ("v5 lite" in kind) or ("v5e" in kind) or ("v5lite" in kind)

    if is_v7:
        # 64 MiB physical VMEM per TensorCore: keep total footprint <= ~44 MiB.
        return dict(tm=256, weight_budget=20 << 20, vmem_cap=44 << 20)
    if is_v5e:
        # 4x128^2 MXU -> 128-row tiles; 128 MiB physical VMEM.
        return dict(tm=128, weight_budget=36 << 20, vmem_cap=80 << 20)
    # v6e (and default): 2x256^2 MXU, 128 MiB physical VMEM.
    return dict(tm=256, weight_budget=40 << 20, vmem_cap=96 << 20)


def vit_output(hidden_states, input_tensor, weight, bias, *, tm=None,
               compute_dtype=None, weight_block_budget_bytes=None):
    """hidden_states: [B, S, I], input_tensor: [B, S, H],
    weight: [I, H], bias: [H]  ->  [B, S, H]

    compute_dtype: e.g. jnp.bfloat16 to use the bf16 MXU path (activation tile
    is cast inside the kernel; accumulation stays f32).
    """
    B, S, I = hidden_states.shape
    H = input_tensor.shape[-1]
    M = B * S
    out_dtype = jnp.result_type(hidden_states.dtype, input_tensor.dtype)

    gen = _tpu_generation_defaults()
    if tm is None:
        tm = gen["tm"]
    if weight_block_budget_bytes is None:
        weight_block_budget_bytes = gen["weight_budget"]

    # Weight pre-cast happens once here (real models should cast at param load
    # so repeated calls don't re-cast); activations are cast inside the kernel.
    w = weight if compute_dtype is None else weight.astype(compute_dtype)

    def nbytes(d):
        return jnp.dtype(d).itemsize

    h_bytes, w_bytes = nbytes(hidden_states.dtype), nbytes(w.dtype)
    r_bytes, o_bytes = nbytes(input_tensor.dtype), nbytes(out_dtype)

    # --- row (M) tiling: no padding; the partial edge block is write-masked --
    tm = max(8, (tm // 8) * 8)
    tm_eff = min(tm, (M // 8) * 8) if M >= 8 else M   # block == full dim is legal
    nm = pl.cdiv(M, tm_eff)
    # (v7x megacore: row axis is "parallel"; typical ViT M = B*197 with tm=256
    #  gives a large nm, so both TensorCores stay balanced.)

    # --- K (intermediate) tiling: only if the 2x-buffered W slice blows budget
    if 2 * I * H * w_bytes <= weight_block_budget_bytes or I <= 128:
        nk, tk, Ip = 1, I, I
    else:
        tk_max = max(128,
                     (weight_block_budget_bytes // (2 * H * w_bytes)) // 128 * 128)
        nk0 = pl.cdiv(I, tk_max)
        tk = _round_up(pl.cdiv(I, nk0), 128)          # nk*tk barely covers I
        nk = pl.cdiv(I, tk)
        Ip = nk * tk
        # NOTE: this fallback re-streams each weight K-slice once per row tile;
        # prefer raising weight_block_budget_bytes so W stays resident.

    h2 = hidden_states.reshape(M, I)                  # free metadata reshape
    r2 = input_tensor.reshape(M, H)
    b2 = bias.reshape(1, H)
    if Ip > I:
        # Reduction coverage must stay exact: zero-pad only the K tail
        # (the M axis is never padded).
        h2 = jnp.pad(h2, ((0, 0), (0, Ip - I)))
        w = jnp.pad(w, ((0, Ip - I), (0, 0)))

    # --- VMEM footprint (double-buffered pipeline tiles) ---------------------
    footprint = (2 * tm_eff * tk * h_bytes            # activation tiles
                 + 2 * tk * H * w_bytes               # weight slice (constant
                                                      #  index when nk==1 -> DMA'd once)
                 + 2 * tm_eff * H * r_bytes           # residual tiles
                 + 2 * tm_eff * H * o_bytes           # output tiles
                 + 2 * H * nbytes(bias.dtype))        # bias
    if nk > 1:
        footprint += tm_eff * H * 4                   # f32 accumulator scratch
    vmem_limit = int(min(max(int(footprint * 1.4) + (2 << 20), 16 << 20),
                         gen["vmem_cap"]))
    # TODO(synk): on v7x, pipeline_mode=pl.Buffered(1) on the constant-index
    # weight BlockSpec would halve its VMEM residency in the nk==1 path.

    cost = pl.CostEstimate(
        flops=2 * M * I * H,
        transcendentals=0,
        bytes_accessed=(M * I * h_bytes
                        + Ip * H * w_bytes * (nm if nk > 1 else 1)
                        + M * H * (r_bytes + o_bytes)
                        + H * nbytes(bias.dtype)),
    )

    if nk == 1:
        kernel = functools.partial(_vit_output_kernel_fused,
                                   compute_dtype=compute_dtype)
        grid_spec = pltpu.PrefetchScalarGridSpec(
            num_scalar_prefetch=0,
            grid=(nm,),
            in_specs=[
                pl.BlockSpec((tm_eff, Ip), lambda i: (i, 0)),    # activations
                pl.BlockSpec((Ip, H), lambda i: (0, 0)),         # weight (resident)
                pl.BlockSpec((1, H), lambda i: (0, 0)),          # bias
                pl.BlockSpec((tm_eff, H), lambda i: (i, 0)),     # residual
            ],
            out_specs=pl.BlockSpec((tm_eff, H), lambda i: (i, 0)),
        )
        dim_sem = ("parallel",)
    else:
        kernel = functools.partial(_vit_output_kernel_ktiled,
                                   compute_dtype=compute_dtype)
        grid_spec = pltpu.PrefetchScalarGridSpec(
            num_scalar_prefetch=0,
            grid=(nm, nk),
            in_specs=[
                pl.BlockSpec((tm_eff, tk), lambda i, k: (i, k)),  # activations
                pl.BlockSpec((tk, H), lambda i, k: (k, 0)),       # weight K-slice
                pl.BlockSpec((1, H), lambda i, k: (0, 0)),        # bias
                pl.BlockSpec((tm_eff, H), lambda i, k: (i, 0)),   # residual
            ],
            out_specs=pl.BlockSpec((tm_eff, H), lambda i, k: (i, 0)),
            scratch_shapes=[pltpu.VMEM((tm_eff, H), jnp.float32)],
        )
        dim_sem = ("parallel", "arbitrary")

    out = pl.pallas_call(
        kernel,
        out_shape=jax.ShapeDtypeStruct((M, H), out_dtype),
        grid_spec=grid_spec,
        compiler_params=pltpu.CompilerParams(
            dimension_semantics=dim_sem,
            vmem_limit_bytes=vmem_limit,
        ),
        cost_estimate=cost,
        # No input_output_aliases: callers don't donate input_tensor, so an
        # alias would only force a defensive HBM copy of the residual.
    )(h2, w, b2, r2)

    return out.reshape(B, S, H)


def reference(hidden_states, input_tensor, weight, bias):
    return jnp.einsum("bsi,ih->bsh", hidden_states, weight) + bias + input_tensor


if __name__ == "__main__":
    key = jax.random.PRNGKey(0)
    k1, k2, k3, k4 = jax.random.split(key, 4)

    # Small ViT-like config: intermediate_size=64, hidden_size=32, batch=2, seq=8.
    B, S, I, H = 2, 8, 64, 32
    hidden_states = jax.random.normal(k1, (B, S, I), dtype=jnp.float32)
    input_tensor = jax.random.normal(k2, (B, S, H), dtype=jnp.float32)
    # Deterministic synthetic parameters (not a checkpoint load).
    weight = jax.random.normal(k3, (I, H), dtype=jnp.float32) * 0.02
    bias = jax.random.normal(k4, (H,), dtype=jnp.float32) * 0.02

    # --- test 1: f32, aligned rows, fused nk==1 path -------------------------
    out = jax.block_until_ready(vit_output(hidden_states, input_tensor, weight, bias))
    ref = reference(hidden_states, input_tensor, weight, bias)
    assert out.shape == (B, S, H)
    assert jnp.allclose(out, ref, atol=1e-5, rtol=1e-5), "f32 mismatch vs reference"

    # --- test 2: bf16 compute (in-kernel cast) + non-tile-aligned rows -------
    B2, S2 = 2, 13   # M = 26 -> partial last row block, no wrapper padding
    hs2 = jax.random.normal(k1, (B2, S2, I), dtype=jnp.float32)
    it2 = jax.random.normal(k2, (B2, S2, H), dtype=jnp.float32)
    out2 = jax.block_until_ready(
        vit_output(hs2, it2, weight, bias, compute_dtype=jnp.bfloat16))
    ref2 = reference(hs2, it2, weight, bias)
    assert out2.shape == (B2, S2, H)
    assert jnp.allclose(out2, ref2, atol=3e-2, rtol=3e-2), "bf16 mismatch vs reference"

    # --- test 3: force the K-tiled fallback (tiny weight budget, padded K) ---
    I3, H3 = 320, 256
    hs3 = jax.random.normal(k1, (B, S, I3), dtype=jnp.float32)
    it3 = jax.random.normal(k2, (B, S, H3), dtype=jnp.float32)
    w3 = jax.random.normal(k3, (I3, H3), dtype=jnp.float32) * 0.02
    b3 = jax.random.normal(k4, (H3,), dtype=jnp.float32) * 0.02
    out3 = jax.block_until_ready(
        vit_output(hs3, it3, w3, b3, weight_block_budget_bytes=256 << 10))
    ref3 = reference(hs3, it3, w3, b3)
    assert out3.shape == (B, S, H3)
    assert jnp.allclose(out3, ref3, atol=1e-3, rtol=1e-3), "K-tiled mismatch vs reference"

    print("KERNEL_OK")
</pallas_src>

<mosaic_0001>
module attributes {stable_mosaic.version = 11 : i64} {
  func.func @_vit_output_kernel_fused(%arg0: i32, %arg1: memref<16x64xf32, #tpu.memory_space<vmem>>, %arg2: memref<64x32xf32, #tpu.memory_space<vmem>>, %arg3: memref<1x32xf32, #tpu.memory_space<vmem>>, %arg4: memref<16x32xf32, #tpu.memory_space<vmem>>, %arg5: memref<16x32xf32, #tpu.memory_space<vmem>>) attributes {dimension_semantics = [#tpu.dimension_semantics<parallel>], iteration_bounds = array<i64: 1>, scalar_prefetch = 0 : i64, scratch_operands = 0 : i64, tpu.core_type = #tpu.core_type<tc>, window_params = [{transform_indices = @transform_0, window_bounds = array<i64: 16, 64>}, {pipeline_mode = #tpu.pipeline_mode<synchronous>, transform_indices = @transform_1, window_bounds = array<i64: 64, 32>}, {pipeline_mode = #tpu.pipeline_mode<synchronous>, transform_indices = @transform_2, window_bounds = array<i64: 1, 32>}, {transform_indices = @transform_3, window_bounds = array<i64: 16, 32>}, {transform_indices = @transform_4, window_bounds = array<i64: 16, 32>}]} {
    %c0 = arith.constant 0 : index
    %c0_0 = arith.constant 0 : index
    %0 = vector.load %arg1[%c0, %c0_0] : memref<16x64xf32, #tpu.memory_space<vmem>>, vector<16x64xf32>
    %c0_1 = arith.constant 0 : index
    %c0_2 = arith.constant 0 : index
    %1 = vector.load %arg2[%c0_1, %c0_2] : memref<64x32xf32, #tpu.memory_space<vmem>>, vector<64x32xf32>
    %cst = arith.constant dense<0.000000e+00> : vector<16x32xf32>
    %2 = tpu.matmul %0, %1, %cst {dimension_numbers = #tpu.dot_dimension_numbers<[1], [0], [0], [1], [0, 0, 1, 1], [], []>} : vector<16x64xf32>, vector<64x32xf32>, vector<16x32xf32> -> vector<16x32xf32>
    %c0_3 = arith.constant 0 : index
    %c0_4 = arith.constant 0 : index
    %3 = vector.load %arg3[%c0_3, %c0_4] : memref<1x32xf32, #tpu.memory_space<vmem>>, vector<1x32xf32>
    %4 = vector.broadcast %3 : vector<1x32xf32> to vector<16x32xf32>
    %5 = arith.addf %2, %4 : vector<16x32xf32>
    %c0_5 = arith.constant 0 : index
    %c0_6 = arith.constant 0 : index
    %6 = vector.load %arg4[%c0_5, %c0_6] : memref<16x32xf32, #tpu.memory_space<vmem>>, vector<16x32xf32>
    %7 = arith.addf %5, %6 : vector<16x32xf32>
    %c0_7 = arith.constant 0 : index
    %c0_8 = arith.constant 0 : index
    %8 = vector.load %arg5[%c0_7, %c0_8] : memref<16x32xf32, #tpu.memory_space<vmem>>, vector<16x32xf32>
    tpu.vector_store %arg5[%c0_7, %c0_8], %7 {strides = array<i32>} : memref<16x32xf32, #tpu.memory_space<vmem>>, vector<16x32xf32>,
    return
  }
  func.func @transform_0(%arg0: i32) -> (i32, i32) {
    %c0_i32 = arith.constant 0 : i32
    %c0_i32_0 = arith.constant 0 : i32
    return %arg0, %c0_i32 : i32, i32
  }
  func.func @transform_1(%arg0: i32) -> (i32, i32) {
    %c0_i32 = arith.constant 0 : i32
    %c0_i32_0 = arith.constant 0 : i32
    %c0_i32_1 = arith.constant 0 : i32
    return %c0_i32, %c0_i32_0 : i32, i32
  }
  func.func @transform_2(%arg0: i32) -> (i32, i32) {
    %c0_i32 = arith.constant 0 : i32
    %c0_i32_0 = arith.constant 0 : i32
    %c0_i32_1 = arith.constant 0 : i32
    return %c0_i32, %c0_i32_0 : i32, i32
  }
  func.func @transform_3(%arg0: i32) -> (i32, i32) {
    %c0_i32 = arith.constant 0 : i32
    %c0_i32_0 = arith.constant 0 : i32
    return %arg0, %c0_i32 : i32, i32
  }
  func.func @transform_4(%arg0: i32) -> (i32, i32) {
    %c0_i32 = arith.constant 0 : i32
    %c0_i32_0 = arith.constant 0 : i32
    return %arg0, %c0_i32 : i32, i32
  }
}

</mosaic_0001>

<bundles_post_ra>
// kernel: tpu_custom_call.1
= control target key start
LH: loop header
LB: loop body
LE: loop exit
PB: predicated region body
PF: predicated region fallthrough
CT: control target
= control target key end

     0   :  { %vm35_vm0 = vcmask 523264   ;;  %s296_s0 = inlined_call_operand.vmem [shape: f32[16,64], index: 0, kind: input, shape index: {}]   ;;  %s297_s1 = inlined_call_operand.vmem [shape: f32[64,32], index: 1, kind: input, shape index: {}]   ;;  %s298_s2 = inlined_call_operand.vmem [shape: f32[1,32], index: 2, kind: input, shape index: {}]   ;;  %s299_s3 = inlined_call_operand.vmem [shape: f32[16,32], index: 3, kind: input, shape index: {}]   ;;  %s300_s4 = inlined_call_operand.hbm [shape: f32[16,32], index: 4, kind: output, shape index: {}]  }
   0x1   :  { %v20_v0 = vld [vmem:[%s297_s1] sm:$0xff]  ;;  %v21_v1 = vld [vmem:[%s297_s1 + $0x8] sm:$0xff]  ;;  %v22_v2 = vld [vmem:[%s297_s1 + $0x10] sm:$0xff] }
   0x2   :  { %v172_v3 = vpack.c.bf16 %v21_v1, %v20_v0  ;;  %v23_v4 = vld [vmem:[%s297_s1 + $0x18] sm:$0xff]  ;;  %v24_v6 = vld [vmem:[%s297_s1 + $0x20] sm:$0xff]  ;;  %v25_v7 = vld [vmem:[%s297_s1 + $0x28] sm:$0xff] }
   0x3   :  { %v176_v5 = vpack.c.bf16 %v23_v4, %v22_v2  ;;  %v18_v8 = vld [vmem:[%s296_s0] sm:$0xff] }
   0x4   :  { %173 = vmatprep.subr.bf16.mxu0 %v172_v3  ;;  %169 = vmatprep.mubr.msk.f32.mxu0 %vm35_vm0, %v18_v8 }
   0x5   :  { %9 = vsyncpa [#allocation3], 0  ;;  %175 = vmatpush3.bf16.msra.mxu0 %v172_v3  ;;  %v180_v9 = vpack.c.bf16 %v25_v7, %v24_v6  ;;  %v26_v10 = vld [vmem:[%s297_s1 + $0x30] sm:$0xff]  ;;  %v27_v11 = vld [vmem:[%s297_s1 + $0x38] sm:$0xff]  ;;  %s215_s1 = smov [#allocation2]   ;;  %vm121_vm1 = vcmask 261120  }
   0x6   :  { %177 = vmatprep.subr.bf16.mxu0 %v176_v5  ;;  %v184_v12 = vpack.c.bf16 %v27_v11, %v26_v10  ;;  %v19_v13 = vld [vmem:[%s296_s0 + $0x8] sm:$0xff]  ;;  %v140_v14 = vld [vmem:[%s298_s2] ss:$0 sm:$0xff]  ;;  %s129_s13 = sshll.u32 %s215_s1, 4  ;;  %s130_s13 = int_to_ptr.vmem [resolvable:$true] %s129_s13 }
   0x7   :  { %v118_v16 = vld [vmem:[%s299_s3 + $0x8] sm:$0xff]  ;;  %v117_v19 = vld [vmem:[%s299_s3] sm:$0xff]  ;;  %s191_s0 = scalar_lea.vmem %s130_s13, 256  ;;  %p196_p1 = scmp.lt.s32.totalorder %s130_s13, %s130_s13 }
   0x8   :  { %p192_p0 = scmp.ne.s32.totalorder %s130_s13, %s191_s0  ;;  %p197_p2 = scmp.lt.s32.totalorder %s191_s0, %s191_s0 }
   0x9   :  { %179 = vmatpush3.bf16.msra.mxu0 %v176_v5 }
   0xa   :  { %181 = vmatprep.subr.bf16.mxu0 %v180_v9  ;;  %p198_p3 = por %p197_p2, %p196_p1 }
   0xc   :  { %p199_p4 = pnand %p198_p3, %p192_p0 }
   0xd   :  { %183 = vmatpush3.bf16.msra.mxu0 %v180_v9 }
   0xe   :  { %185 = vmatprep.subr.bf16.mxu0 %v184_v12 }
  0x11   :  { %187 = vmatpush3.bf16.msra.mxu0 %v184_v12 }
  0x14   :  { %170 = vmatmul.mubr.msk.f32.vlgmr.msra.gmra.mrb[0].mxu0 %vm35_vm0, %v19_v13 }
  0xe7   :  { %v171_v15 = vpop.f32.mrb[0].mxu0 }
  0xe8   :  { %v114_v17 = vadd.f32 %v171_v15, %v140_v14  ;;  %v108_v18 = vpop.f32.mrb[1].mxu0 }
  0xe9   :  { %v109_v20 = vadd.f32 %v140_v14, %v108_v18 }
  0xea   :  { %v120_v21 = vadd.f32 %v118_v16, %v114_v17 }
  0xeb   :  { %v119_v22 = vadd.f32 %v117_v19, %v109_v20 }
  0xec   :  { %123 = vst.msk [vmem:[#allocation2 + $0x8] sm:$0xff] %vm121_vm1, %v120_v21 }
  0xed   :  { %122 = vst.msk [vmem:[#allocation2] sm:$0xff] %vm121_vm1, %v119_v22 }
  0xee   :  { %202 = shalt.err (!%p199_p4)
}
  0xef   :  { %s203_s17 = scalar_lea.hbm %s300_s4, 256 }
  0xf0   :  { %p204_p5 = scmp.ne.s32.totalorder %s300_s4, %s203_s17  ;;  %p207_p6 = scmp.lt.u32.totalorder %s203_s17, %s300_s4 }
  0xf2   :  { %p209_p7 = pnand %p207_p6, %p204_p5 }
  0xf4   :  { %212 = shalt.err (!%p209_p7)
}
  0xf5   :  { %s216_s21 = smov 128   ;;  %s217_s22 = smov 8  }
  0xf6   :  { %135 = dma.vmem_to_hbm [thread:$0]  %s130_s13, 256, %s300_s4, [#allocation3], %s216_s21, %s216_s21, %s217_s22  }
  0xf7   :  { %213 = dma.done.wait [#allocation3], 256  }
  0xf8   :  { %214 = vsyncadd [#allocation3], 4294967040 }
  0xf9   :  { %139 = vsyncpa [#allocation3], 1 }

</bundles_post_ra>
